<compile_context>
chip_gen: v7x
topology: tpu7x:2x2x1
jax: 0.10.0
libtpu: 0.0.40
codegen_flags: <defaults>
</compile_context>

<pallas_src>
import jax
import jax.numpy as jnp
from jax.experimental import pallas as pl
from jax.experimental.pallas import tpu as pltpu

HIDDEN = 512  # fixed by the module


def _round_up(x, m):
    return ((x + m - 1) // m) * m


def _pick_bm(B):
    """Batch tile. Big enough to make the w1 stream MXU-bound (v6e wants ~>=700 rows),
    but keep >=2 batch tiles for large B so both v7x TensorCores get work."""
    if B <= 512:
        return max(16, _round_up(B, 16))                # one tile, minimal padding
    if B <= 2048:
        return max(256, _round_up((B + 1) // 2, 16))    # two balanced tiles (v7x megacore)
    return 1024


def pack_params(w1, b1, w2, b2, *, tk_max=2048):
    """One-time weight packing: bf16 cast + lane/K padding. Call once at init."""
    D, H = w1.shape
    C = w2.shape[1]
    Cp = _round_up(C, 128)          # lane-dense output stores, full MXU columns
    if D <= tk_max:
        tk, Dp = D, D               # w1 resident per batch tile, no K-tiling
    else:
        tk = tk_max
        Dp = _round_up(D, tk)

    w1_bf = w1.astype(jnp.bfloat16)
    if Dp != D:
        w1_bf = jnp.pad(w1_bf, ((0, Dp - D), (0, 0)))
    w2_bf = w2.astype(jnp.bfloat16)
    if Cp != C:
        w2_bf = jnp.pad(w2_bf, ((0, 0), (0, Cp - C)))
    b1_f = b1.reshape(1, H).astype(jnp.float32)
    b2_f = jnp.pad(b2.reshape(1, C).astype(jnp.float32), ((0, 0), (0, Cp - C)))

    return dict(w1=w1_bf, b1=b1_f, w2=w2_bf, b2=b2_f,
                D=D, Dp=Dp, tk=tk, H=H, C=C, Cp=Cp)


def _mlp_kernel(x_ref, w1_ref, b1_ref, w2_ref, b2_ref, o_ref, acc_ref):
    """One (bm x Cp) output tile.  Grid = (batch tiles, K tiles over input_size)."""
    k = pl.program_id(1)

    @pl.when(k == 0)
    def _init():
        # Seed the f32 accumulator with b1 (broadcast) -> no separate bias add later.
        acc_ref[...] = jnp.broadcast_to(b1_ref[...], acc_ref.shape)

    # acc += x_tile @ w1_slab  (bf16 operands, f32 accumulation on the MXU)
    acc_ref[...] += jnp.dot(x_ref[...], w1_ref[...],
                            preferred_element_type=jnp.float32)

    @pl.when(k == pl.num_programs(1) - 1)
    def _finalize():
        # ReLU in f32 (safe on v5e: no bf16 VALU), then cast for the 2nd MXU pass.
        h = jnp.maximum(acc_ref[...], 0.0).astype(w2_ref.dtype)
        # Dropout(p=0.5) in eval/inference mode is the identity.
        # TODO(synk): training-mode dropout (pltpu.prng_random_bits mask + 2x scale) not emitted.
        y = jnp.dot(h, w2_ref[...], preferred_element_type=jnp.float32)
        o_ref[...] = (y + b2_ref[...]).astype(o_ref.dtype)


def feature_classifier(x, packed, *, bm=None):
    """Computes relu(x @ w1 + b1) @ w2 + b2 (dropout in eval mode).

    x: [B, D] f32.  `packed` comes from pack_params() (bf16, padded weights).
    Weights are stored transposed vs. PyTorch nn.Linear (y = x @ W + b).
    """
    B, D = x.shape
    assert D == packed["D"], "input_size mismatch with packed weights"
    H, C, Cp = packed["H"], packed["C"], packed["Cp"]
    Dp, tk = packed["Dp"], packed["tk"]

    if bm is None:
        bm = _pick_bm(B)
    Bp = _round_up(B, bm)

    # Explicit VMEM budget (double-buffered inputs/outputs + resident blocks + scratch).
    vmem_bytes = (2 * bm * tk * 2        # x tile (bf16, dbl-buffered)
                  + 2 * tk * H * 2       # w1 slab (bf16, dbl-buffered)
                  + bm * H * 4           # f32 hidden accumulator (scratch)
                  + 2 * bm * Cp * 4      # out tile (f32, dbl-buffered)
                  + 2 * H * Cp * 2       # w2 (resident, dbl-buffered)
                  + 2 * (H + Cp) * 4)    # biases
    # Clears v5e's 16 MiB scoped default; stays under v7x's 64 MiB physical.
    vmem_limit = int(min(max(32 << 20, vmem_bytes + (4 << 20)), 56 << 20))

    # Single fused cast+pad pass over the activations.
    x_bf = x.astype(jnp.bfloat16)
    if Bp != B or Dp != D:
        x_bf = jnp.pad(x_bf, ((0, Bp - B), (0, Dp - D)))

    grid = (Bp // bm, Dp // tk)

    out = pl.pallas_call(
        _mlp_kernel,
        out_shape=jax.ShapeDtypeStruct((Bp, Cp), jnp.float32),
        grid_spec=pltpu.PrefetchScalarGridSpec(
            num_scalar_prefetch=0,
            grid=grid,
            in_specs=[
                pl.BlockSpec((bm, tk), lambda i, k: (i, k)),   # x batch/K tile
                pl.BlockSpec((tk, H), lambda i, k: (k, 0)),    # w1 K-slab
                pl.BlockSpec((1, H), lambda i, k: (0, 0)),     # b1 (resident)
                pl.BlockSpec((H, Cp), lambda i, k: (0, 0)),    # w2 (resident)
                pl.BlockSpec((1, Cp), lambda i, k: (0, 0)),    # b2 (resident)
            ],
            out_specs=pl.BlockSpec((bm, Cp), lambda i, k: (i, 0)),
            scratch_shapes=[pltpu.VMEM((bm, H), jnp.float32)],  # f32 hidden accumulator
        ),
        compiler_params=pltpu.CompilerParams(
            dimension_semantics=("parallel", "arbitrary"),
            vmem_limit_bytes=vmem_limit),
    )(x_bf, packed["w1"], packed["b1"], packed["w2"], packed["b2"])

    return out[:B, :C]


def _reference_bf16(x, w1, b1, w2, b2):
    h = jnp.dot(x.astype(jnp.bfloat16), w1.astype(jnp.bfloat16),
                preferred_element_type=jnp.float32) + b1.reshape(1, -1)
    h = jnp.maximum(h, 0.0)
    return jnp.dot(h.astype(jnp.bfloat16), w2.astype(jnp.bfloat16),
                   preferred_element_type=jnp.float32) + b2.reshape(1, -1)


def _reference_f32(x, w1, b1, w2, b2):
    h = jnp.maximum(x @ w1 + b1.reshape(1, -1), 0.0)
    return h @ w2 + b2.reshape(1, -1)


if __name__ == "__main__":
    B = 16      # batch
    D = 64      # input_size
    H = HIDDEN  # hidden (fixed by the module)
    C = 10      # num_classes

    key = jax.random.PRNGKey(0)
    kx, k1, kb1, k2, kb2 = jax.random.split(key, 5)

    bound1 = 1.0 / D ** 0.5
    bound2 = 1.0 / H ** 0.5
    x = jax.random.normal(kx, (B, D), dtype=jnp.float32)
    w1 = jax.random.uniform(k1, (D, H), jnp.float32, -bound1, bound1)
    b1 = jax.random.uniform(kb1, (1, H), jnp.float32, -bound1, bound1)
    w2 = jax.random.uniform(k2, (H, C), jnp.float32, -bound2, bound2)
    b2 = jax.random.uniform(kb2, (1, C), jnp.float32, -bound2, bound2)

    packed = pack_params(w1, b1, w2, b2)       # one-time weight packing
    out = feature_classifier(x, packed)
    out = jax.block_until_ready(out)
    assert out.shape == (B, C)

    ref_bf16 = _reference_bf16(x, w1, b1, w2, b2)
    ref_f32 = _reference_f32(x, w1, b1, w2, b2)
    assert jnp.allclose(out, ref_bf16, atol=2e-3, rtol=2e-3), "mismatch vs bf16-matched reference"
    assert jnp.allclose(out, ref_f32, atol=5e-2, rtol=5e-2), "mismatch vs f32 reference"

    print("KERNEL_OK")
</pallas_src>

<mosaic_0001>
module attributes {stable_mosaic.version = 11 : i64} {
  func.func @_mlp_kernel(%arg0: i32, %arg1: i32, %arg2: memref<16x64xbf16, #tpu.memory_space<vmem>>, %arg3: memref<64x512xbf16, #tpu.memory_space<vmem>>, %arg4: memref<1x512xf32, #tpu.memory_space<vmem>>, %arg5: memref<512x128xbf16, #tpu.memory_space<vmem>>, %arg6: memref<1x128xf32, #tpu.memory_space<vmem>>, %arg7: memref<16x128xf32, #tpu.memory_space<vmem>>, %arg8: memref<16x512xf32, #tpu.memory_space<vmem>>) attributes {dimension_semantics = [#tpu.dimension_semantics<parallel>, #tpu.dimension_semantics<arbitrary>], iteration_bounds = array<i64: 1, 1>, scalar_prefetch = 0 : i64, scratch_operands = 1 : i64, tpu.core_type = #tpu.core_type<tc>, window_params = [{transform_indices = @transform_0, window_bounds = array<i64: 16, 64>}, {transform_indices = @transform_1, window_bounds = array<i64: 64, 512>}, {pipeline_mode = #tpu.pipeline_mode<synchronous>, transform_indices = @transform_2, window_bounds = array<i64: 1, 512>}, {pipeline_mode = #tpu.pipeline_mode<synchronous>, transform_indices = @transform_3, window_bounds = array<i64: 512, 128>}, {pipeline_mode = #tpu.pipeline_mode<synchronous>, transform_indices = @transform_4, window_bounds = array<i64: 1, 128>}, {transform_indices = @transform_5, window_bounds = array<i64: 16, 128>}]} {
    %c0_i32 = arith.constant 0 : i32
    %0 = arith.cmpi eq, %arg1, %c0_i32 : i32
    %1 = arith.extui %0 : i1 to i32
    %c0_i32_0 = arith.constant 0 : i32
    %2 = arith.cmpi ne, %1, %c0_i32_0 : i32
    scf.if %2 {
      %c0_10 = arith.constant 0 : index
      %c0_11 = arith.constant 0 : index
      %12 = vector.load %arg4[%c0_10, %c0_11] : memref<1x512xf32, #tpu.memory_space<vmem>>, vector<1x512xf32>
      %13 = vector.shape_cast %12 : vector<1x512xf32> to vector<1x512xf32>
      %14 = vector.broadcast %13 : vector<1x512xf32> to vector<16x512xf32>
      %c0_12 = arith.constant 0 : index
      %c0_13 = arith.constant 0 : index
      %15 = vector.load %arg8[%c0_12, %c0_13] : memref<16x512xf32, #tpu.memory_space<vmem>>, vector<16x512xf32>
      tpu.vector_store %arg8[%c0_12, %c0_13], %14 {strides = array<i32>} : memref<16x512xf32, #tpu.memory_space<vmem>>, vector<16x512xf32>,
    } else {
    }
    %c0 = arith.constant 0 : index
    %c0_1 = arith.constant 0 : index
    %3 = vector.load %arg8[%c0, %c0_1] : memref<16x512xf32, #tpu.memory_space<vmem>>, vector<16x512xf32>
    %c0_2 = arith.constant 0 : index
    %c0_3 = arith.constant 0 : index
    %4 = vector.load %arg2[%c0_2, %c0_3] : memref<16x64xbf16, #tpu.memory_space<vmem>>, vector<16x64xbf16>
    %c0_4 = arith.constant 0 : index
    %c0_5 = arith.constant 0 : index
    %5 = vector.load %arg3[%c0_4, %c0_5] : memref<64x512xbf16, #tpu.memory_space<vmem>>, vector<64x512xbf16>
    %cst = arith.constant dense<0.000000e+00> : vector<16x512xf32>
    %6 = tpu.matmul %4, %5, %cst {dimension_numbers = #tpu.dot_dimension_numbers<[1], [0], [0], [1], [0, 0, 1, 1], [], []>} : vector<16x64xbf16>, vector<64x512xbf16>, vector<16x512xf32> -> vector<16x512xf32>
    %7 = arith.addf %3, %6 : vector<16x512xf32>
    %c0_6 = arith.constant 0 : index
    %c0_7 = arith.constant 0 : index
    %8 = vector.load %arg8[%c0_6, %c0_7] : memref<16x512xf32, #tpu.memory_space<vmem>>, vector<16x512xf32>
    tpu.vector_store %arg8[%c0_6, %c0_7], %7 {strides = array<i32>} : memref<16x512xf32, #tpu.memory_space<vmem>>, vector<16x512xf32>,
    %c0_i32_8 = arith.constant 0 : i32
    %9 = arith.cmpi eq, %arg1, %c0_i32_8 : i32
    %10 = arith.extui %9 : i1 to i32
    %c0_i32_9 = arith.constant 0 : i32
    %11 = arith.cmpi ne, %10, %c0_i32_9 : i32
    scf.if %11 {
      %c0_10 = arith.constant 0 : index
      %c0_11 = arith.constant 0 : index
      %12 = vector.load %arg8[%c0_10, %c0_11] : memref<16x512xf32, #tpu.memory_space<vmem>>, vector<16x512xf32>
      %cst_12 = arith.constant 0.000000e+00 : f32
      %13 = vector.broadcast %cst_12 : f32 to vector<16x512xf32>
      %14 = arith.maximumf %12, %13 : vector<16x512xf32>
      %15 = arith.truncf %14 : vector<16x512xf32> to vector<16x512xbf16>
      %c0_13 = arith.constant 0 : index
      %c0_14 = arith.constant 0 : index
      %16 = vector.load %arg5[%c0_13, %c0_14] : memref<512x128xbf16, #tpu.memory_space<vmem>>, vector<512x128xbf16>
      %cst_15 = arith.constant dense<0.000000e+00> : vector<16x128xf32>
      %17 = tpu.matmul %15, %16, %cst_15 {dimension_numbers = #tpu.dot_dimension_numbers<[1], [0], [0], [1], [0, 0, 1, 1], [], []>} : vector<16x512xbf16>, vector<512x128xbf16>, vector<16x128xf32> -> vector<16x128xf32>
      %c0_16 = arith.constant 0 : index
      %c0_17 = arith.constant 0 : index
      %18 = vector.load %arg6[%c0_16, %c0_17] : memref<1x128xf32, #tpu.memory_space<vmem>>, vector<1x128xf32>
      %19 = vector.broadcast %18 : vector<1x128xf32> to vector<16x128xf32>
      %20 = arith.addf %17, %19 : vector<16x128xf32>
      %c0_18 = arith.constant 0 : index
      %c0_19 = arith.constant 0 : index
      %21 = vector.load %arg7[%c0_18, %c0_19] : memref<16x128xf32, #tpu.memory_space<vmem>>, vector<16x128xf32>
      tpu.vector_store %arg7[%c0_18, %c0_19], %20 {strides = array<i32>} : memref<16x128xf32, #tpu.memory_space<vmem>>, vector<16x128xf32>,
    } else {
    }
    return
  }
  func.func @transform_0(%arg0: i32, %arg1: i32) -> (i32, i32) {
    %c0_i32 = arith.constant 0 : i32
    return %arg0, %arg1 : i32, i32
  }
  func.func @transform_1(%arg0: i32, %arg1: i32) -> (i32, i32) {
    %c0_i32 = arith.constant 0 : i32
    %c0_i32_0 = arith.constant 0 : i32
    return %arg1, %c0_i32 : i32, i32
  }
  func.func @transform_2(%arg0: i32, %arg1: i32) -> (i32, i32) {
    %c0_i32 = arith.constant 0 : i32
    %c0_i32_0 = arith.constant 0 : i32
    %c0_i32_1 = arith.constant 0 : i32
    return %c0_i32, %c0_i32_0 : i32, i32
  }
  func.func @transform_3(%arg0: i32, %arg1: i32) -> (i32, i32) {
    %c0_i32 = arith.constant 0 : i32
    %c0_i32_0 = arith.constant 0 : i32
    %c0_i32_1 = arith.constant 0 : i32
    return %c0_i32, %c0_i32_0 : i32, i32
  }
  func.func @transform_4(%arg0: i32, %arg1: i32) -> (i32, i32) {
    %c0_i32 = arith.constant 0 : i32
    %c0_i32_0 = arith.constant 0 : i32
    %c0_i32_1 = arith.constant 0 : i32
    return %c0_i32, %c0_i32_0 : i32, i32
  }
  func.func @transform_5(%arg0: i32, %arg1: i32) -> (i32, i32) {
    %c0_i32 = arith.constant 0 : i32
    %c0_i32_0 = arith.constant 0 : i32
    return %arg0, %c0_i32 : i32, i32
  }
}

</mosaic_0001>

<bundles_post_ra>
// kernel: tpu_custom_call.1
= control target key start
LH: loop header
LB: loop body
LE: loop exit
PB: predicated region body
PF: predicated region fallthrough
CT: control target
= control target key end

     0   :  { %10 = vsyncpa [#allocation4], 0  ;;  %s1055_s0 = inlined_call_operand.hbm [shape: bf16[16,64], index: 0, kind: input, shape index: {}]   ;;  %s1056_s1 = inlined_call_operand.hbm [shape: bf16[64,512], index: 1, kind: input, shape index: {}]   ;;  %s1057_s2 = inlined_call_operand.vmem [shape: f32[1,512], index: 2, kind: input, shape index: {}]   ;;  %s1058_s3 = inlined_call_operand.hbm [shape: bf16[512,128], index: 3, kind: input, shape index: {}]   ;;  %s1059_s4 = inlined_call_operand.vmem [shape: f32[1,128], index: 4, kind: input, shape index: {}]   ;;  %s1060_s5 = inlined_call_operand.hbm [shape: f32[16,128], index: 5, kind: output, shape index: {}]  }
   0x1   :  { %11 = vsyncpa [#allocation7], 0 }
   0x2   :  { %12 = vsyncpa [#allocation5], 0  ;;  %s960_s18 = smov [#allocation6]   ;;  %s866_s22 = scalar_lea.hbm %s1056_s1, 2048 }
   0x3   :  { %s30_s19 = sshll.u32 %s960_s18, 4  ;;  %p867_p0 = scmp.ne.s32.totalorder %s1056_s1, %s866_s22  ;;  %s31_s19 = int_to_ptr.vmem [resolvable:$true] %s30_s19 }
   0x4   :  { %p870_p1 = scmp.lt.u32.totalorder %s866_s22, %s1056_s1 }
   0x6   :  { %p872_p2 = pnand %p870_p1, %p867_p0 }
   0x8   :  { %875 = shalt.err (!%p872_p2)
}
   0x9   :  { %s876_s27 = scalar_lea.vmem %s31_s19, 2048  ;;  %p881_p4 = scmp.lt.s32.totalorder %s31_s19, %s31_s19 }
   0xa   :  { %p877_p3 = scmp.ne.s32.totalorder %s31_s19, %s876_s27  ;;  %p882_p5 = scmp.lt.s32.totalorder %s876_s27, %s876_s27 }
   0xc   :  { %p883_p6 = por %p882_p5, %p881_p4 }
   0xe   :  { %p884_p7 = pnand %p883_p6, %p877_p3 }
  0x10   :  { %887 = shalt.err (!%p884_p7)
}
  0x11   :  { %s961_s28 = smov 256   ;;  %s962_s29 = smov 16  }
  0x12   :  { %36 = dma.hbm_to_vmem [thread:$0]  %s1056_s1, 2048, %s31_s19, [#allocation7], %s961_s28, %s961_s28, %s962_s29  }
  0x13   :  { %s963_s7 = smov [#allocation3]   ;;  %s888_s11 = scalar_lea.hbm %s1055_s0, 128 }
  0x14   :  { %s18_s8 = sshll.u32 %s963_s7, 4  ;;  %p889_p8 = scmp.ne.s32.totalorder %s1055_s0, %s888_s11  ;;  %s19_s8 = int_to_ptr.vmem [resolvable:$true] %s18_s8 }
  0x15   :  { %p892_p9 = scmp.lt.u32.totalorder %s888_s11, %s1055_s0 }
  0x17   :  { %p894_p10 = pnand %p892_p9, %p889_p8 }
  0x19   :  { %897 = shalt.err (!%p894_p10)
}
  0x1a   :  { %s898_s16 = scalar_lea.vmem %s19_s8, 128  ;;  %p903_p12 = scmp.lt.s32.totalorder %s19_s8, %s19_s8 }
  0x1b   :  { %p899_p11 = scmp.ne.s32.totalorder %s19_s8, %s898_s16  ;;  %p904_p13 = scmp.lt.s32.totalorder %s898_s16, %s898_s16 }
  0x1d   :  { %p905_p0 = por %p904_p13, %p903_p12 }
  0x1f   :  { %p906_p1 = pnand %p905_p0, %p899_p11 }
  0x21   :  { %909 = shalt.err (!%p906_p1)
}
  0x22   :  { %s964_s1 = smov 64   ;;  %s965_s17 = smov 4  }
  0x23   :  { %24 = dma.hbm_to_vmem [thread:$0]  %s1055_s0, 128, %s19_s8, [#allocation4], %s964_s1, %s964_s1, %s965_s17  }
  0x24   :  { %s966_s20 = smov [#allocation8]   ;;  %s910_s24 = scalar_lea.hbm %s1058_s3, 4096 }
  0x25   :  { %s44_s21 = sshll.u32 %s966_s20, 4  ;;  %p911_p2 = scmp.ne.s32.totalorder %s1058_s3, %s910_s24  ;;  %s45_s21 = int_to_ptr.vmem [resolvable:$true] %s44_s21 }
  0x26   :  { %p914_p3 = scmp.lt.u32.totalorder %s910_s24, %s1058_s3 }
  0x28   :  { %p916_p4 = pnand %p914_p3, %p911_p2 }
  0x2a   :  { %919 = shalt.err (!%p916_p4)
}
  0x2b   :  { %s920_s29 = scalar_lea.vmem %s45_s21, 4096  ;;  %p925_p6 = scmp.lt.s32.totalorder %s45_s21, %s45_s21 }
  0x2c   :  { %p921_p5 = scmp.ne.s32.totalorder %s45_s21, %s920_s29  ;;  %p926_p7 = scmp.lt.s32.totalorder %s920_s29, %s920_s29 }
  0x2e   :  { %p927_p8 = por %p926_p7, %p925_p6 }
  0x30   :  { %p928_p9 = pnand %p927_p8, %p921_p5 }
  0x32   :  { %931 = shalt.err (!%p928_p9)
}
  0x33   :  { %50 = dma.hbm_to_vmem [thread:$0]  %s1058_s3, 4096, %s45_s21, [#allocation7], %s964_s1, %s964_s1, %s965_s17  }
  0x34   :  { %954 = dma.done.wait [#allocation4], 128  }
  0x35   :  { %955 = vsyncadd [#allocation4], 4294967168 }
  0x36   :  { %956 = dma.done.wait [#allocation7], 6144  }
  0x37   :  { %957 = vsyncadd [#allocation7], 4294961152  ;;  %v967_v0 = vmov 0   ;;  %v809_v1 = vld [vmem:[#allocation6 + $0x4] ss:$16 sps:$4 sm:$0xff]   ;;  %v833_v18 = vld [vmem:[#allocation3] sm:$0xff]   ;;  %v69_v50 = vlaneseq }
  0x38   :  { %244 = vmatprep.mubr.bf16.mxu0 %v967_v0  ;;  %287 = vmatprep.mubr.bf16.mxu1 %v967_v0  ;;  %v811_v2 = vld [vmem:[#allocation6 + $0xc] ss:$16 sps:$4 sm:$0xff]   ;;  %v813_v3 = vld [vmem:[#allocation6] ss:$16 sps:$4 sm:$0xff]   ;;  %v814_v4 = vld [vmem:[#allocation6 + $0x8] ss:$16 sps:$4 sm:$0xff]  }
  0x39   :  { %212 = vmatprep.subr.bf16.mxu0 %v809_v1  ;;  %255 = vmatprep.subr.bf16.mxu1 %v811_v2  ;;  %v815_v5 = vld [vmem:[#allocation6 + $0x24] ss:$16 sps:$4 sm:$0xff]   ;;  %v817_v6 = vld [vmem:[#allocation6 + $0x2c] ss:$16 sps:$4 sm:$0xff]   ;;  %v819_v7 = vld [vmem:[#allocation6 + $0x20] ss:$16 sps:$4 sm:$0xff]  }
  0x3a   :  { %213 = vmatpush1.bf16.msra.mxu0 %v813_v3  ;;  %256 = vmatpush1.bf16.msra.mxu1 %v814_v4  ;;  %v820_v8 = vld [vmem:[#allocation6 + $0x28] ss:$16 sps:$4 sm:$0xff]   ;;  %v821_v9 = vld [vmem:[#allocation6 + $0x44] ss:$16 sps:$4 sm:$0xff]   ;;  %v823_v10 = vld [vmem:[#allocation6 + $0x4c] ss:$16 sps:$4 sm:$0xff]  }
  0x3b   :  { %214 = vmatprep.subr.bf16.mxu0 %v815_v5  ;;  %257 = vmatprep.subr.bf16.mxu1 %v817_v6  ;;  %v825_v11 = vld [vmem:[#allocation6 + $0x40] ss:$16 sps:$4 sm:$0xff]   ;;  %v826_v12 = vld [vmem:[#allocation6 + $0x48] ss:$16 sps:$4 sm:$0xff]   ;;  %v827_v13 = vld [vmem:[#allocation6 + $0x64] ss:$16 sps:$4 sm:$0xff]  }
  0x3c   :  { %v829_v14 = vld [vmem:[#allocation6 + $0x6c] ss:$16 sps:$4 sm:$0xff]   ;;  %v831_v15 = vld [vmem:[#allocation6 + $0x60] ss:$16 sps:$4 sm:$0xff]   ;;  %v832_v16 = vld [vmem:[#allocation6 + $0x68] ss:$16 sps:$4 sm:$0xff]  }
  0x3d   :  { %v834_v17 = vld [vmem:[#allocation8 + $0x40] sm:$0xff]   ;;  %vm208_vm0 = vcmask 523264   ;;  %v838_v22 = vld [vmem:[#allocation8 + $0x48] sm:$0xff]   ;;  %v842_v26 = vld [vmem:[#allocation8 + $0x50] sm:$0xff]   ;;  %v70_v51 = vshrl.u32 %v69_v50, 7  ;;  %s968_s8 = smov [#allocation9]  }
  0x3e   :  { %215 = vmatpush1.bf16.msra.mxu0 %v819_v7  ;;  %258 = vmatpush1.bf16.msra.mxu1 %v820_v8  ;;  %v835_v19 = vld [vmem:[#allocation8 + $0xc0] sm:$0xff]   ;;  %v839_v23 = vld [vmem:[#allocation8 + $0xc8] sm:$0xff]   ;;  %v843_v27 = vld [vmem:[#allocation8 + $0xd0] sm:$0xff]   ;;  %s689_s9 = sshll.u32 %s968_s8, 4  ;;  %s690_s9 = int_to_ptr.vmem [resolvable:$true] %s689_s9 }
  0x3f   :  { %216 = vmatprep.subr.bf16.mxu0 %v821_v9  ;;  %259 = vmatprep.subr.bf16.mxu1 %v823_v10  ;;  %v836_v20 = vld [vmem:[#allocation8] sm:$0xff]   ;;  %v840_v24 = vld [vmem:[#allocation8 + $0x8] sm:$0xff]   ;;  %v844_v28 = vld [vmem:[#allocation8 + $0x10] sm:$0xff]   ;;  %v71_v52 = vsub.s32 0, %v70_v51  ;;  %v79_v53 = vsub.s32 2, %v70_v51  ;;  %v75_v55 = vsub.s32 1, %v70_v51  ;;  %p937_p11 = scmp.lt.s32.totalorder %s690_s9, %s690_s9 }
  0x40   :  { %v837_v21 = vld [vmem:[#allocation8 + $0x80] sm:$0xff]   ;;  %v841_v25 = vld [vmem:[#allocation8 + $0x88] sm:$0xff]   ;;  %v845_v29 = vld [vmem:[#allocation8 + $0x90] sm:$0xff]   ;;  %v83_v56 = vsub.s32 3, %v70_v51 }
  0x41   :  { %v846_v30 = vld [vmem:[#allocation8 + $0x58] sm:$0xff]   ;;  %v850_v34 = vld [vmem:[#allocation8 + $0x60] sm:$0xff]   ;;  %v854_v38 = vld [vmem:[#allocation8 + $0x68] sm:$0xff]  }
  0x42   :  { %217 = vmatpush1.bf16.msra.mxu0 %v825_v11  ;;  %260 = vmatpush1.bf16.msra.mxu1 %v826_v12  ;;  %v847_v31 = vld [vmem:[#allocation8 + $0xd8] sm:$0xff]   ;;  %v851_v35 = vld [vmem:[#allocation8 + $0xe0] sm:$0xff]   ;;  %v855_v39 = vld [vmem:[#allocation8 + $0xe8] sm:$0xff]  }
  0x43   :  { %218 = vmatprep.subr.bf16.mxu0 %v827_v13  ;;  %261 = vmatprep.subr.bf16.mxu1 %v829_v14  ;;  %v848_v32 = vld [vmem:[#allocation8 + $0x18] sm:$0xff]   ;;  %v852_v36 = vld [vmem:[#allocation8 + $0x20] sm:$0xff]   ;;  %v856_v40 = vld [vmem:[#allocation8 + $0x28] sm:$0xff]  }
  0x44   :  { %v849_v33 = vld [vmem:[#allocation8 + $0x98] sm:$0xff]   ;;  %v853_v37 = vld [vmem:[#allocation8 + $0xa0] sm:$0xff]   ;;  %v857_v41 = vld [vmem:[#allocation8 + $0xa8] sm:$0xff]  }
  0x45   :  { %v858_v42 = vld [vmem:[#allocation8 + $0x70] sm:$0xff]   ;;  %v862_v46 = vld [vmem:[#allocation8 + $0x78] sm:$0xff]  }
  0x46   :  { %219 = vmatpush1.bf16.msra.mxu0 %v831_v15  ;;  %262 = vmatpush1.bf16.msra.mxu1 %v832_v16  ;;  %v859_v43 = vld [vmem:[#allocation8 + $0xf0] sm:$0xff]   ;;  %v863_v47 = vld [vmem:[#allocation8 + $0xf8] sm:$0xff]  }
  0x47   :  { %754 = vmatprep.subr.bf16.mxu0 %v834_v17  ;;  %776 = vmatprep.subr.bf16.mxu1 %v835_v19  ;;  %v860_v44 = vld [vmem:[#allocation8 + $0x30] sm:$0xff]   ;;  %v864_v48 = vld [vmem:[#allocation8 + $0x38] sm:$0xff]  }
  0x48   :  { %v861_v45 = vld [vmem:[#allocation8 + $0xb0] sm:$0xff]   ;;  %v865_v49 = vld [vmem:[#allocation8 + $0xb8] sm:$0xff]  }
  0x49   :  { %719 = vmatmul.mubr.msk.bf16.vlgmr.msra.gmra.mrb[0].mxu0 %vm208_vm0, %v833_v18  ;;  %720 = vmatmul.mubr.msk.bf16.vlgmr.msra.gmra.mrb[0].mxu1 %vm208_vm0, %v833_v18  ;;  %v67_v54 = vld [vmem:[%s1057_s2] sm:$0xf] }
  0x4a   :  { %755 = vmatpush3.bf16.msra.mxu0 %v836_v20  ;;  %777 = vmatpush3.bf16.msra.mxu1 %v837_v21  ;;  %v72_v57 = vrot.slane %v67_v54, %v71_v52  ;;  %v80_v58 = vrot.slane %v67_v54, %v79_v53  ;;  %v76_v59 = vrot.slane %v67_v54, %v75_v55 }
  0x4b   :  { %756 = vmatprep.subr.bf16.mxu0 %v838_v22  ;;  %778 = vmatprep.subr.bf16.mxu1 %v839_v23  ;;  %v84_v60 = vrot.slane %v67_v54, %v83_v56 }
  0x4e   :  { %757 = vmatpush3.bf16.msra.mxu0 %v840_v24  ;;  %779 = vmatpush3.bf16.msra.mxu1 %v841_v25 }
  0x4f   :  { %758 = vmatprep.subr.bf16.mxu0 %v842_v26  ;;  %780 = vmatprep.subr.bf16.mxu1 %v843_v27  ;;  %v721_v27 = vld [vmem:[%s1059_s4] ss:$0 sm:$0xff]  ;;  %s932_s4 = scalar_lea.vmem %s690_s9, 256 }
  0x50   :  { %p933_p10 = scmp.ne.s32.totalorder %s690_s9, %s932_s4  ;;  %p938_p12 = scmp.lt.s32.totalorder %s932_s4, %s932_s4 }
  0x52   :  { %759 = vmatpush3.bf16.msra.mxu0 %v844_v28  ;;  %781 = vmatpush3.bf16.msra.mxu1 %v845_v29  ;;  %p939_p13 = por %p938_p12, %p937_p11 }
  0x53   :  { %760 = vmatprep.subr.bf16.mxu0 %v846_v30  ;;  %782 = vmatprep.subr.bf16.mxu1 %v847_v31 }
  0x54   :  { %p940_p0 = pnand %p939_p13, %p933_p10 }
  0x56   :  { %761 = vmatpush3.bf16.msra.mxu0 %v848_v32  ;;  %783 = vmatpush3.bf16.msra.mxu1 %v849_v33 }
  0x57   :  { %762 = vmatprep.subr.bf16.mxu0 %v850_v34  ;;  %784 = vmatprep.subr.bf16.mxu1 %v851_v35 }
  0x5a   :  { %763 = vmatpush3.bf16.msra.mxu0 %v852_v36  ;;  %785 = vmatpush3.bf16.msra.mxu1 %v853_v37 }
  0x5b   :  { %764 = vmatprep.subr.bf16.mxu0 %v854_v38  ;;  %786 = vmatprep.subr.bf16.mxu1 %v855_v39 }
  0x5e   :  { %765 = vmatpush3.bf16.msra.mxu0 %v856_v40  ;;  %787 = vmatpush3.bf16.msra.mxu1 %v857_v41 }
  0x5f   :  { %766 = vmatprep.subr.bf16.mxu0 %v858_v42  ;;  %788 = vmatprep.subr.bf16.mxu1 %v859_v43 }
  0x62   :  { %767 = vmatpush3.bf16.msra.mxu0 %v860_v44  ;;  %789 = vmatpush3.bf16.msra.mxu1 %v861_v45 }
  0x63   :  { %768 = vmatprep.subr.bf16.mxu0 %v862_v46  ;;  %790 = vmatprep.subr.bf16.mxu1 %v863_v47 }
  0x66   :  { %769 = vmatpush3.bf16.msra.mxu0 %v864_v48  ;;  %791 = vmatpush3.bf16.msra.mxu1 %v865_v49 }
 0x11c   :  { %v246_v61 = vpop.f32.mrb[0].mxu0  ;;  %v289_v62 = vpop.f32.mrb[0].mxu1 }
 0x11d   :  { %v298_v63 = vadd.f32 %v246_v61, %v72_v57  ;;  %v300_v0 = vadd.f32 %v289_v62, %v80_v58  ;;  %v248_v1 = vpop.f32.mrb[1].mxu0  ;;  %v291_v2 = vpop.f32.mrb[1].mxu1 }
 0x11e   :  { %v299_v3 = vadd.f32 %v248_v1, %v76_v59  ;;  %v301_v4 = vadd.f32 %v291_v2, %v84_v60  ;;  %v250_v5 = vpop.f32.mrb[2].mxu0  ;;  %v293_v6 = vpop.f32.mrb[2].mxu1 }
 0x11f   :  { %v327_v7 = vmax.f32 %v300_v0, 0.0  ;;  %v302_v8 = vadd.f32 %v250_v5, %v72_v57  ;;  %v304_v9 = vadd.f32 %v293_v6, %v80_v58  ;;  %v252_v10 = vpop.f32.mrb[3].mxu0  ;;  %v295_v11 = vpop.f32.mrb[3].mxu1  ;;  %v325_v15 = vmax.f32 %v298_v63, 0.0 }
 0x120   :  { %v328_v12 = vmax.f32 %v301_v4, 0.0  ;;  %v303_v13 = vadd.f32 %v252_v10, %v76_v59  ;;  %v305_v14 = vadd.f32 %v295_v11, %v84_v60  ;;  %v326_v18 = vmax.f32 %v299_v3, 0.0 }
 0x121   :  { %v329_v16 = vmax.f32 %v302_v8, 0.0  ;;  %v331_v17 = vmax.f32 %v304_v9, 0.0 }
 0x122   :  { %v330_v19 = vmax.f32 %v303_v13, 0.0  ;;  %v332_v20 = vmax.f32 %v305_v14, 0.0 }
 0x123   :  { %v333_v21 = vpack.c.bf16 %v329_v16, %v325_v15  ;;  %v335_v22 = vpack.c.bf16 %v331_v17, %v327_v7 }
 0x124   :  { %v334_v23 = vpack.c.bf16 %v330_v19, %v326_v18  ;;  %v336_v24 = vpack.c.bf16 %v332_v20, %v328_v12 }
 0x126   :  { %632 = vmatprep.mubr.bf16.mxu0 %v334_v23  ;;  %673 = vmatprep.mubr.bf16.mxu1 %v336_v24 }
 0x127   :  { %633 = vmatmul.mubr.bf16.vlgmr.msra.gmra.mrb[4].mxu0 %v333_v21  ;;  %674 = vmatmul.mubr.bf16.vlgmr.msra.gmra.mrb[4].mxu1 %v335_v22 }
 0x1fa   :  { %v770_v25 = vpop.f32.mrb[4].mxu0  ;;  %v792_v26 = vpop.f32.mrb[4].mxu1 }
 0x1fb   :  { %v771_v28 = vpop.f32.mrb[5].mxu0  ;;  %v793_v29 = vpop.f32.mrb[5].mxu1 }
 0x1fc   :  { %v772_v30 = vadd.f32 %v771_v28, %v770_v25  ;;  %v794_v31 = vadd.f32 %v793_v29, %v792_v26  ;;  %v773_v32 = vpop.f32.mrb[6].mxu0  ;;  %v795_v33 = vpop.f32.mrb[6].mxu1 }
 0x1fd   :  { %v774_v34 = vpop.f32.mrb[7].mxu0  ;;  %v796_v35 = vpop.f32.mrb[7].mxu1 }
 0x1fe   :  { %v635_v36 = vadd.f32 %v772_v30, %v721_v27  ;;  %v775_v37 = vadd.f32 %v774_v34, %v773_v32  ;;  %v797_v38 = vadd.f32 %v796_v35, %v795_v33 }
 0x200   :  { %v676_v39 = vadd.f32 %v794_v31, %v635_v36  ;;  %v638_v40 = vadd.f32 %v775_v37, %v721_v27 }
 0x202   :  { %682 = vst [vmem:[#allocation9] sm:$0xff] %v676_v39  ;;  %v679_v41 = vadd.f32 %v797_v38, %v638_v40 }
 0x204   :  { %683 = vst [vmem:[#allocation9 + $0x8] sm:$0xff] %v679_v41 }
 0x205   :  { %943 = shalt.err (!%p940_p0)
}
 0x206   :  { %s944_s12 = scalar_lea.hbm %s1060_s5, 256 }
 0x207   :  { %p945_p1 = scmp.ne.s32.totalorder %s1060_s5, %s944_s12  ;;  %p948_p2 = scmp.lt.u32.totalorder %s944_s12, %s1060_s5 }
 0x209   :  { %p950_p3 = pnand %p948_p2, %p945_p1 }
 0x20b   :  { %953 = shalt.err (!%p950_p3)
}
 0x20c   :  { %s969_s1 = smov 128   ;;  %s970_s17 = smov 8  }
 0x20d   :  { %695 = dma.vmem_to_hbm [thread:$0]  %s690_s9, 256, %s1060_s5, [#allocation5], %s969_s1, %s969_s1, %s970_s17  }
 0x20e   :  { %958 = dma.done.wait [#allocation5], 256  }
 0x20f   :  { %959 = vsyncadd [#allocation5], 4294967040 }
 0x210   :  { %699 = vsyncpa [#allocation4], 1 }
 0x211   :  { %700 = vsyncpa [#allocation7], 1 }
 0x212   :  { %701 = vsyncpa [#allocation5], 1 }

</bundles_post_ra>
